<compile_context>
chip_gen: v6e
topology: v6e:2x2x1
jax: 0.10.0
libtpu: 0.0.40
codegen_flags: <defaults>
</compile_context>

<pallas_src>
import jax
import jax.numpy as jnp
from jax.experimental import pallas as pl
from jax.experimental.pallas import tpu as pltpu


def _disc_kernel(x_ref, w1_ref, b1_ref, w2_ref, b2_ref, w3_ref, b3_ref, o_ref):
    # Cast after load (input may stream as bf16/f32); all math in f32.
    x = x_ref[...].astype(jnp.float32)

    h1 = jnp.dot(x, w1_ref[...], preferred_element_type=jnp.float32) + b1_ref[...]
    h1 = jnp.where(h1 > 0, h1, 0.01 * h1)                      # LeakyReLU(0.01)

    h2 = jnp.dot(h1, w2_ref[...], preferred_element_type=jnp.float32) + b2_ref[...]
    h2 = jnp.where(h2 > 0, h2, 0.01 * h2)                      # LeakyReLU(0.01)

    # (16 -> 1) layer: VPU multiply + XLU lane reduce; avoids an N=1 MXU matmul.
    h3 = jnp.sum(h2 * w3_ref[...], axis=-1, keepdims=True) + b3_ref[...]
    o_ref[...] = jax.nn.sigmoid(h3)                            # Sigmoid (EUP)


def _round_up(x, m):
    return ((x + m - 1) // m) * m


def discriminator_forward(x, params):
    """x: any shape (B, ...); flattened to (B, D) like inputs.view(B, -1)."""
    b = x.shape[0]
    feat = x.reshape(b, -1)            # keep native dtype; cast happens in-kernel
    d = feat.shape[1]
    w1, b1, w2, b2, w3_row, b3 = params

    # Zero-pad feature dim to a lane-dense multiple of 128; matching zero rows
    # on w1 keep the dot product identical.
    d_pad = _round_up(d, 128)
    if d_pad != d:
        feat = jnp.pad(feat, ((0, 0), (0, d_pad - d)))
        w1 = jnp.pad(w1, ((0, d_pad - d), (0, 0)))

    itemsize = jnp.dtype(feat.dtype).itemsize

    # Batch tile: aim for >=512 rows, but keep 2 * TM * D_pad * itemsize (the
    # double-buffered x tiles) comfortably under the 32 MiB scoped-VMEM budget
    # that holds across v5e / v6e / v7x.
    x_tile_budget = 24 * 1024 * 1024
    tm_cap = max(8, ((x_tile_budget // (2 * d_pad * itemsize)) // 8) * 8)
    tm = min(512, tm_cap, _round_up(b, 8))

    b_pad = _round_up(b, tm)
    if b_pad != b:
        feat = jnp.pad(feat, ((0, b_pad - b), (0, 0)))

    grid = (pl.cdiv(b_pad, tm),)

    weight_bytes = 4 * (d_pad * 16 + 16 + 16 * 16 + 16 + 16 + 1)
    cost = pl.CostEstimate(
        flops=2 * b_pad * (d_pad * 16 + 16 * 16 + 16),
        transcendentals=b_pad,
        bytes_accessed=b_pad * d_pad * itemsize + b_pad * 4 + weight_bytes,
    )

    out = pl.pallas_call(
        _disc_kernel,
        out_shape=jax.ShapeDtypeStruct((b_pad, 1), jnp.float32),
        grid=grid,
        in_specs=[
            pl.BlockSpec((tm, d_pad), lambda i: (i, 0)),   # x tile (streamed)
            pl.BlockSpec((d_pad, 16), lambda i: (0, 0)),   # w1
            pl.BlockSpec((1, 16), lambda i: (0, 0)),       # b1
            pl.BlockSpec((16, 16), lambda i: (0, 0)),      # w2
            pl.BlockSpec((1, 16), lambda i: (0, 0)),       # b2
            pl.BlockSpec((1, 16), lambda i: (0, 0)),       # w3 (row form)
            pl.BlockSpec((1, 1), lambda i: (0, 0)),        # b3
        ],
        out_specs=pl.BlockSpec((tm, 1), lambda i: (i, 0)),
        compiler_params=pltpu.CompilerParams(
            dimension_semantics=("parallel",),             # megacore on v7x
            vmem_limit_bytes=32 * 1024 * 1024,
        ),
        cost_estimate=cost,
    )(feat, w1, b1, w2, b2, w3_row, b3)

    return out[:b]


def init_params(key, output_size):
    """Deterministic init mirroring nn.Linear's U(-1/sqrt(fan_in), +1/sqrt(fan_in)).

    w1, w2 are stored as (in_features, out_features) = PyTorch weight.T so the
    kernel computes x @ W. The final layer's weight is kept as a (1, 16) row
    (same as PyTorch's (out=1, in=16)) for the in-kernel lane reduce.
    """
    def linear_t(key, fan_in, fan_out):
        kw, kb = jax.random.split(key)
        bound = 1.0 / jnp.sqrt(float(fan_in))
        w = jax.random.uniform(kw, (fan_in, fan_out), jnp.float32, -bound, bound)
        b = jax.random.uniform(kb, (1, fan_out), jnp.float32, -bound, bound)
        return w, b

    k1, k2, k3 = jax.random.split(key, 3)
    w1, b1 = linear_t(k1, output_size, 16)
    w2, b2 = linear_t(k2, 16, 16)

    kw3, kb3 = jax.random.split(k3)
    bound3 = 1.0 / jnp.sqrt(16.0)
    w3_row = jax.random.uniform(kw3, (1, 16), jnp.float32, -bound3, bound3)
    b3 = jax.random.uniform(kb3, (1, 1), jnp.float32, -bound3, bound3)
    return (w1, b1, w2, b2, w3_row, b3)


if __name__ == "__main__":
    key = jax.random.PRNGKey(0)
    k_in, k_p = jax.random.split(key)

    # Small deterministic example: batch=2, features 4x8 -> flattened D=32.
    batch, c, s = 2, 4, 8
    output_size = c * s
    x = jax.random.normal(k_in, (batch, c, s), dtype=jnp.float32)

    params = init_params(k_p, output_size)

    y = discriminator_forward(x, params)
    y = jax.block_until_ready(y)

    assert y.shape == (batch, 1)
    assert bool(jnp.all((y >= 0.0) & (y <= 1.0)))
    print("KERNEL_OK")
</pallas_src>

<mosaic_0001>
module attributes {stable_mosaic.version = 11 : i64} {
  func.func @_disc_kernel(%arg0: i32, %arg1: memref<8x128xf32, #tpu.memory_space<vmem>>, %arg2: memref<128x16xf32, #tpu.memory_space<vmem>>, %arg3: memref<1x16xf32, #tpu.memory_space<vmem>>, %arg4: memref<16x16xf32, #tpu.memory_space<vmem>>, %arg5: memref<1x16xf32, #tpu.memory_space<vmem>>, %arg6: memref<1x16xf32, #tpu.memory_space<vmem>>, %arg7: memref<1x1xf32, #tpu.memory_space<vmem>>, %arg8: memref<8x1xf32, #tpu.memory_space<vmem>>) attributes {dimension_semantics = [#tpu.dimension_semantics<parallel>], iteration_bounds = array<i64: 1>, scalar_prefetch = 0 : i64, scratch_operands = 0 : i64, tpu.core_type = #tpu.core_type<tc>, window_params = [{transform_indices = @transform_0, window_bounds = array<i64: 8, 128>}, {pipeline_mode = #tpu.pipeline_mode<synchronous>, transform_indices = @transform_1, window_bounds = array<i64: 128, 16>}, {pipeline_mode = #tpu.pipeline_mode<synchronous>, transform_indices = @transform_2, window_bounds = array<i64: 1, 16>}, {pipeline_mode = #tpu.pipeline_mode<synchronous>, transform_indices = @transform_3, window_bounds = array<i64: 16, 16>}, {pipeline_mode = #tpu.pipeline_mode<synchronous>, transform_indices = @transform_4, window_bounds = array<i64: 1, 16>}, {pipeline_mode = #tpu.pipeline_mode<synchronous>, transform_indices = @transform_5, window_bounds = array<i64: 1, 16>}, {pipeline_mode = #tpu.pipeline_mode<synchronous>, transform_indices = @transform_6, window_bounds = array<i64: 1, 1>}, {transform_indices = @transform_7, window_bounds = array<i64: 8, 1>}]} {
    %c0 = arith.constant 0 : index
    %c0_0 = arith.constant 0 : index
    %0 = vector.load %arg1[%c0, %c0_0] : memref<8x128xf32, #tpu.memory_space<vmem>>, vector<8x128xf32>
    %c0_1 = arith.constant 0 : index
    %c0_2 = arith.constant 0 : index
    %1 = vector.load %arg2[%c0_1, %c0_2] : memref<128x16xf32, #tpu.memory_space<vmem>>, vector<128x16xf32>
    %cst = arith.constant dense<0.000000e+00> : vector<8x16xf32>
    %2 = tpu.matmul %0, %1, %cst {dimension_numbers = #tpu.dot_dimension_numbers<[1], [0], [0], [1], [0, 0, 1, 1], [], []>} : vector<8x128xf32>, vector<128x16xf32>, vector<8x16xf32> -> vector<8x16xf32>
    %c0_3 = arith.constant 0 : index
    %c0_4 = arith.constant 0 : index
    %3 = vector.load %arg3[%c0_3, %c0_4] : memref<1x16xf32, #tpu.memory_space<vmem>>, vector<1x16xf32>
    %4 = vector.broadcast %3 : vector<1x16xf32> to vector<8x16xf32>
    %5 = arith.addf %2, %4 : vector<8x16xf32>
    %cst_5 = arith.constant 0.000000e+00 : f32
    %6 = vector.broadcast %cst_5 : f32 to vector<8x16xf32>
    %7 = arith.cmpf ogt, %5, %6 : vector<8x16xf32>
    %cst_6 = arith.constant 0.00999999977 : f32
    %8 = vector.broadcast %cst_6 : f32 to vector<8x16xf32>
    %9 = arith.mulf %8, %5 : vector<8x16xf32>
    %10 = arith.select %7, %5, %9 : vector<8x16xi1>, vector<8x16xf32>
    %c0_7 = arith.constant 0 : index
    %c0_8 = arith.constant 0 : index
    %11 = vector.load %arg4[%c0_7, %c0_8] : memref<16x16xf32, #tpu.memory_space<vmem>>, vector<16x16xf32>
    %cst_9 = arith.constant dense<0.000000e+00> : vector<8x16xf32>
    %12 = tpu.matmul %10, %11, %cst_9 {dimension_numbers = #tpu.dot_dimension_numbers<[1], [0], [0], [1], [0, 0, 1, 1], [], []>} : vector<8x16xf32>, vector<16x16xf32>, vector<8x16xf32> -> vector<8x16xf32>
    %c0_10 = arith.constant 0 : index
    %c0_11 = arith.constant 0 : index
    %13 = vector.load %arg5[%c0_10, %c0_11] : memref<1x16xf32, #tpu.memory_space<vmem>>, vector<1x16xf32>
    %14 = vector.broadcast %13 : vector<1x16xf32> to vector<8x16xf32>
    %15 = arith.addf %12, %14 : vector<8x16xf32>
    %cst_12 = arith.constant 0.000000e+00 : f32
    %16 = vector.broadcast %cst_12 : f32 to vector<8x16xf32>
    %17 = arith.cmpf ogt, %15, %16 : vector<8x16xf32>
    %cst_13 = arith.constant 0.00999999977 : f32
    %18 = vector.broadcast %cst_13 : f32 to vector<8x16xf32>
    %19 = arith.mulf %18, %15 : vector<8x16xf32>
    %20 = arith.select %17, %15, %19 : vector<8x16xi1>, vector<8x16xf32>
    %c0_14 = arith.constant 0 : index
    %c0_15 = arith.constant 0 : index
    %21 = vector.load %arg6[%c0_14, %c0_15] : memref<1x16xf32, #tpu.memory_space<vmem>>, vector<1x16xf32>
    %22 = vector.broadcast %21 : vector<1x16xf32> to vector<8x16xf32>
    %23 = arith.mulf %20, %22 : vector<8x16xf32>
    %cst_16 = arith.constant dense<0.000000e+00> : vector<8xf32>
    %24 = vector.multi_reduction <add>, %23, %cst_16 [1] : vector<8x16xf32> to vector<8xf32>
    %25 = vector.shape_cast %24 : vector<8xf32> to vector<8x1xf32>
    %c0_17 = arith.constant 0 : index
    %c0_18 = arith.constant 0 : index
    %26 = vector.load %arg7[%c0_17, %c0_18] : memref<1x1xf32, #tpu.memory_space<vmem>>, vector<1x1xf32>
    %27 = vector.broadcast %26 : vector<1x1xf32> to vector<8x1xf32>
    %28 = arith.addf %25, %27 : vector<8x1xf32>
    %29 = arith.negf %28 : vector<8x1xf32>
    %30 = math.exp %29 : vector<8x1xf32>
    %cst_19 = arith.constant 1.000000e+00 : f32
    %31 = vector.broadcast %cst_19 : f32 to vector<8x1xf32>
    %32 = arith.addf %31, %30 : vector<8x1xf32>
    %33 = arith.divf %31, %32 : vector<8x1xf32>
    %c0_20 = arith.constant 0 : index
    %c0_21 = arith.constant 0 : index
    %34 = vector.load %arg8[%c0_20, %c0_21] : memref<8x1xf32, #tpu.memory_space<vmem>>, vector<8x1xf32>
    tpu.vector_store %arg8[%c0_20, %c0_21], %33 {strides = array<i32>} : memref<8x1xf32, #tpu.memory_space<vmem>>, vector<8x1xf32>,
    return
  }
  func.func @transform_0(%arg0: i32) -> (i32, i32) {
    %c0_i32 = arith.constant 0 : i32
    %c0_i32_0 = arith.constant 0 : i32
    return %arg0, %c0_i32 : i32, i32
  }
  func.func @transform_1(%arg0: i32) -> (i32, i32) {
    %c0_i32 = arith.constant 0 : i32
    %c0_i32_0 = arith.constant 0 : i32
    %c0_i32_1 = arith.constant 0 : i32
    return %c0_i32, %c0_i32_0 : i32, i32
  }
  func.func @transform_2(%arg0: i32) -> (i32, i32) {
    %c0_i32 = arith.constant 0 : i32
    %c0_i32_0 = arith.constant 0 : i32
    %c0_i32_1 = arith.constant 0 : i32
    return %c0_i32, %c0_i32_0 : i32, i32
  }
  func.func @transform_3(%arg0: i32) -> (i32, i32) {
    %c0_i32 = arith.constant 0 : i32
    %c0_i32_0 = arith.constant 0 : i32
    %c0_i32_1 = arith.constant 0 : i32
    return %c0_i32, %c0_i32_0 : i32, i32
  }
  func.func @transform_4(%arg0: i32) -> (i32, i32) {
    %c0_i32 = arith.constant 0 : i32
    %c0_i32_0 = arith.constant 0 : i32
    %c0_i32_1 = arith.constant 0 : i32
    return %c0_i32, %c0_i32_0 : i32, i32
  }
  func.func @transform_5(%arg0: i32) -> (i32, i32) {
    %c0_i32 = arith.constant 0 : i32
    %c0_i32_0 = arith.constant 0 : i32
    %c0_i32_1 = arith.constant 0 : i32
    return %c0_i32, %c0_i32_0 : i32, i32
  }
  func.func @transform_6(%arg0: i32) -> (i32, i32) {
    %c0_i32 = arith.constant 0 : i32
    %c0_i32_0 = arith.constant 0 : i32
    %c0_i32_1 = arith.constant 0 : i32
    return %c0_i32, %c0_i32_0 : i32, i32
  }
  func.func @transform_7(%arg0: i32) -> (i32, i32) {
    %c0_i32 = arith.constant 0 : i32
    %c0_i32_0 = arith.constant 0 : i32
    return %arg0, %c0_i32 : i32, i32
  }
}

</mosaic_0001>

<bundles_post_ra>
// kernel: tpu_custom_call.1
= control target key start
LH: loop header
LB: loop body
LE: loop exit
PB: predicated region body
PF: predicated region fallthrough
CT: control target
= control target key end

     0   :  { %v316_v0 = vmov 0.0   ;;  %vm317_vm0 = vmmov 0   ;;  %vm134_vm2 = vcmask 130048   ;;  %vm236_vm4 = vcmask 7168   ;;  %s432_s1 = inlined_call_operand.vmem [shape: f32[128,16], index: 1, kind: input, shape index: {}]   ;;  %s433_s0 = inlined_call_operand.vmem [shape: f32[8,128], index: 0, kind: input, shape index: {}]   ;;  %s434_s3 = inlined_call_operand.vmem [shape: f32[16,16], index: 3, kind: input, shape index: {}]   ;;  %s435_s2 = inlined_call_operand.vmem [shape: f32[1,16], index: 2, kind: input, shape index: {}]   ;;  %s436_s6 = inlined_call_operand.<no memory space> [shape: f32[1,1], index: 6, kind: input, shape index: {}]   ;;  %s437_s4 = inlined_call_operand.vmem [shape: f32[1,16], index: 4, kind: input, shape index: {}]   ;;  %s438_s5 = inlined_call_operand.vmem [shape: f32[1,16], index: 5, kind: input, shape index: {}]   ;;  %s439_s7 = inlined_call_operand.vmem [shape: f32[8,1], index: 7, kind: output, shape index: {}]  }
   0x1   :  { %268 = vmatprep.subr.mxu0 %v316_v0  ;;  %v44_v1 = vld [vmem:[%s432_s1 + $0x78] sm:$0xff]  ;;  %v43_v2 = vld [vmem:[%s432_s1 + $0x70] sm:$0xff]  ;;  %300 = vmatprep.mubr.msk.f32.mxu0 %vm317_vm0, %v316_v0  ;;  %v42_v3 = vld [vmem:[%s432_s1 + $0x68] sm:$0xff]  ;;  %v12_v26 = vstv %s436_s6 }
   0x2   :  { %269 = vmatpush3.msra.mxu0 %v44_v1  ;;  %303 = vmatprep.subr.mxu1 %v316_v0  ;;  %v41_v4 = vld [vmem:[%s432_s1 + $0x60] sm:$0xff]  ;;  %v40_v5 = vld [vmem:[%s432_s1 + $0x58] sm:$0xff]  ;;  %v39_v6 = vld [vmem:[%s432_s1 + $0x50] sm:$0xff]  ;;  %13 = vst [vmem:[#allocation2] sm:$0x1] %v12_v26 }
   0x3   :  { %270 = vmatprep.subr.mxu0 %v316_v0  ;;  %307 = vmatprep.mubr.msk.f32.mxu1 %vm317_vm0, %v316_v0  ;;  %v38_v7 = vld [vmem:[%s432_s1 + $0x48] sm:$0xff]  ;;  %v37_v8 = vld [vmem:[%s432_s1 + $0x40] sm:$0xff]  ;;  %v36_v9 = vld [vmem:[%s432_s1 + $0x38] sm:$0xff] }
   0x4   :  { %271 = vmatpush3.msra.mxu0 %v43_v2  ;;  %v35_v10 = vld [vmem:[%s432_s1 + $0x30] sm:$0xff]  ;;  %v34_v11 = vld [vmem:[%s432_s1 + $0x28] sm:$0xff]  ;;  %v33_v12 = vld [vmem:[%s432_s1 + $0x20] sm:$0xff] }
   0x5   :  { %272 = vmatprep.subr.mxu0 %v316_v0  ;;  %v32_v13 = vld [vmem:[%s432_s1 + $0x18] sm:$0xff]  ;;  %v31_v14 = vld [vmem:[%s432_s1 + $0x10] sm:$0xff]  ;;  %v30_v15 = vld [vmem:[%s432_s1 + $0x8] sm:$0xff] }
   0x6   :  { %273 = vmatpush3.msra.mxu0 %v42_v3  ;;  %v29_v16 = vld [vmem:[%s432_s1] sm:$0xff]  ;;  %v126_v18 = vld [vmem:[%s434_s3 + $0x8] sm:$0xff] }
   0x7   :  { %274 = vmatprep.subr.mxu0 %v316_v0  ;;  %v28_v17 = vld [vmem:[%s433_s0] sm:$0xff]  ;;  %304 = vmatpush3.msra.mxu1 %v126_v18 }
   0x8   :  { %275 = vmatpush3.msra.mxu0 %v41_v4  ;;  %v125_v19 = vld [vmem:[%s434_s3] sm:$0xff]  ;;  %305 = vmatprep.subr.mxu1 %v316_v0 }
   0x9   :  { %276 = vmatprep.subr.mxu0 %v316_v0  ;;  %306 = vmatpush3.msra.mxu1 %v125_v19  ;;  %v242_v20 = vld [vmem:[%s435_s2] ss:$0 sm:$0xff] }
   0xa   :  { %277 = vmatpush3.msra.mxu0 %v40_v5  ;;  %v243_v27 = vld [vmem:[%s437_s4] ss:$0 sm:$0xff] }
   0xb   :  { %278 = vmatprep.subr.mxu0 %v316_v0  ;;  %v245_v32 = vld [vmem:[%s438_s5] ss:$0 sm:$0xff] }
   0xc   :  { %279 = vmatpush3.msra.mxu0 %v39_v6  ;;  %v246_v36 = vld [vmem:[#allocation2] ss:$0 sm:$0xff] }
   0xd   :  { %280 = vmatprep.subr.mxu0 %v316_v0 }
   0xe   :  { %281 = vmatpush3.msra.mxu0 %v38_v7 }
   0xf   :  { %282 = vmatprep.subr.mxu0 %v316_v0 }
  0x10   :  { %283 = vmatpush3.msra.mxu0 %v37_v8 }
  0x11   :  { %284 = vmatprep.subr.mxu0 %v316_v0 }
  0x12   :  { %285 = vmatpush3.msra.mxu0 %v36_v9 }
  0x13   :  { %286 = vmatprep.subr.mxu0 %v316_v0 }
  0x14   :  { %287 = vmatpush3.msra.mxu0 %v35_v10 }
  0x15   :  { %288 = vmatprep.subr.mxu0 %v316_v0 }
  0x16   :  { %289 = vmatpush3.msra.mxu0 %v34_v11 }
  0x17   :  { %290 = vmatprep.subr.mxu0 %v316_v0 }
  0x18   :  { %291 = vmatpush3.msra.mxu0 %v33_v12 }
  0x19   :  { %292 = vmatprep.subr.mxu0 %v316_v0 }
  0x1a   :  { %293 = vmatpush3.msra.mxu0 %v32_v13 }
  0x1b   :  { %294 = vmatprep.subr.mxu0 %v316_v0 }
  0x1c   :  { %295 = vmatpush3.msra.mxu0 %v31_v14 }
  0x1d   :  { %296 = vmatprep.subr.mxu0 %v316_v0 }
  0x1e   :  { %297 = vmatpush3.msra.mxu0 %v30_v15 }
  0x1f   :  { %298 = vmatprep.subr.mxu0 %v316_v0 }
  0x20   :  { %299 = vmatpush3.msra.mxu0 %v29_v16 }
  0x21   :  { %301 = vmatmul.mubr.f32.vlgmr.msra.gmra.mxu0 %v28_v17 }
  0xe1   :  { %v118_v21 = vpop.f32.mrf.mxu0 }
  0xe2   :  { %v119_v22 = vadd.f32 %v242_v20, %v118_v21 }
  0xe3   :  { %v302_v23 = vpop.f32.mrf.mxu0 }
  0xe4   :  { %vm122_vm1 = vcmp.gt.f32.partialorder %v119_v22, 0.0  ;;  %v123_v24 = vmul.f32 0.01, %v119_v22 }
  0xe6   :  { %v124_v25 = vsel %vm122_vm1, %v119_v22, %v123_v24 }
  0xe7   :  { %308 = vmatmul.mubr.msk.f32.vlgmr.msra.gmra.mxu1 %vm134_vm2, %v124_v25 }
 0x1a7   :  { %v204_v28 = vpop.f32.mrf.mxu1 }
 0x1a8   :  { %v205_v29 = vadd.f32 %v243_v27, %v204_v28 }
 0x1a9   :  { %v309_v30 = vpop.f32.mrf.mxu1 }
 0x1aa   :  { %v209_v31 = vmul.f32 0.01, %v205_v29  ;;  %vm208_vm3 = vcmp.gt.f32.partialorder %v205_v29, 0.0 }
 0x1ac   :  { %v210_v33 = vsel %vm208_vm3, %v205_v29, %v209_v31 }
 0x1ad   :  { %v218_v34 = vmul.f32 %v245_v32, %v210_v33 }
 0x1af   :  { %v219_v35 = vsel %vm134_vm2, %v218_v34, 0.0 }
 0x1b0   :  { %220 = vadd.xlane.f32.xlu0 %v219_v35 }
 0x239   :  { %v221_v37 = vpop.xlane.xlu0 %220 }
 0x23a   :  { %v229_v38 = vadd.f32 %v246_v36, %v221_v37 }
 0x23c   :  { %v247_v39 = vmul.f32 -1.442695, %v229_v38 }
 0x23e   :  { %312 = vpow2.f32 %v247_v39 }
 0x24b   :  { %v313_v40 = vpop.eup %312 }
 0x24c   :  { %v233_v41 = vadd.f32 1.0, %v313_v40 }
 0x24e   :  { %314 = vrcp.f32 %v233_v41 }
 0x25b   :  { %v315_v42 = vpop.eup %314 }
 0x25c   :  { %237 = vst.msk [vmem:[%s439_s7] sm:$0xff] %vm236_vm4, %v315_v42 }

</bundles_post_ra>
